<compile_context>
chip_gen: v6e
topology: v6e:2x2x1
jax: 0.10.0
libtpu: 0.0.40
codegen_flags: <defaults>
</compile_context>

<pallas_src>
import functools

import jax
import jax.numpy as jnp
from jax.experimental import pallas as pl
from jax.experimental.pallas import tpu as pltpu

BN_EPS = 1e-5


def _round_up(x, m):
    return (x + m - 1) // m * m


def _tpu_budget():
    """(max tile columns, vmem_limit_bytes) derived from physical VMEM size."""
    try:
        cap = int(pltpu.get_tpu_info().vmem_capacity_bytes)
    except Exception:
        cap = 64 * 1024 * 1024              # conservative (v7x-sized) fallback
    max_tn = 2048 if cap > 96 * 1024 * 1024 else 1024
    return max_tn, (3 * cap) // 4


def _pick_tile(nfeat_pad, max_tn):
    # Largest lane-dense tile (multiple of 128) that divides the padded head
    # width, subject to the generation-aware cap.
    for tn in (2048, 1024, 512, 256, 128):
        if tn <= max_tn and nfeat_pad % tn == 0:
            return tn
    return 128


def stage1_kernel(emb_ref, w1_ref, b1_ref, gamma_ref, beta_ref, x_ref):
    # Linear(nhid2->nhid1) + BatchNorm1d (batch stats, biased var) + ReLU.
    h = (
        jnp.dot(emb_ref[...], w1_ref[...], preferred_element_type=jnp.float32)
        + b1_ref[...]
    )
    mu = jnp.mean(h, axis=0, keepdims=True)
    c = h - mu
    var_b = jnp.mean(c * c, axis=0, keepdims=True)          # biased variance
    # Fold BN affine into a single scale/shift -> one FMA per element.
    scale = gamma_ref[...] * jax.lax.rsqrt(var_b + BN_EPS)
    shift = beta_ref[...] - mu * scale
    x_ref[...] = jnp.maximum(h * scale + shift, 0.0)


def head_kernel(x_ref, wh_ref, bh_ref, out_ref):
    # One lane-dense column tile of one head.  The size-1 head axis of
    # wh/bh/out is squeezed away by the BlockSpecs (block dim = None).
    head = pl.program_id(0)                    # 0 = pi, 1 = var, 2 = mean
    xv = x_ref[...].astype(wh_ref.dtype)       # cast activations only at MXU input
    z = (
        jnp.dot(xv, wh_ref[...], preferred_element_type=jnp.float32)
        + bh_ref[...]
    )

    @pl.when(head == 0)
    def _():
        # Numerically-stable sigmoid: denominator is in (1, 2], so the EUP
        # approx reciprocal + one Newton step is safe (~1e-7 rel).
        e = jnp.exp(-jnp.abs(z))
        num = jnp.where(z >= 0.0, 1.0, e)
        d = 1.0 + e
        r = pl.reciprocal(d, approx=True)
        r = r * (2.0 - d * r)                  # one Newton refinement (VPU)
        out_ref[...] = num * r

    @pl.when(head == 1)
    def _():
        # Stable softplus matching torch.nn.functional.softplus.
        sp = jnp.maximum(z, 0.0) + jnp.log1p(jnp.exp(-jnp.abs(z)))
        out_ref[...] = jnp.clip(sp, 1e-4, 1e4)

    @pl.when(head == 2)
    def _():
        out_ref[...] = jnp.clip(jnp.exp(z), 1e-5, 1e6)


@functools.partial(jax.jit, static_argnames=("head_dtype",))
def decoder_forward(emb, params, head_dtype=jnp.bfloat16):
    """emb: (B, nhid2) float32.  params: dict (see init_params).

    head_dtype: dtype of the fused head weights / MXU inputs of the head
    matmul.  bfloat16 (default) halves weight bandwidth on a weight-BW-bound
    kernel; float32 reproduces the PyTorch forward up to f32 rounding.
    """
    B, nhid2 = emb.shape
    nhid1 = params["w1"].shape[1]
    nfeat = params["wpi"].shape[1]

    max_tn, vmem_limit = _tpu_budget()
    nfeat_pad = _round_up(nfeat, 128)
    TN = _pick_tile(nfeat_pad, max_tn)
    tiles_per_head = nfeat_pad // TN
    pad = nfeat_pad - nfeat

    def pad_cols(a):
        return jnp.pad(a, ((0, 0), (0, pad))) if pad else a

    # Fused [pi, var, mean] head weights / biases, head axis leading.
    wh = jnp.stack(
        [pad_cols(params["wpi"]).astype(head_dtype),
         pad_cols(params["wvar"]).astype(head_dtype),
         pad_cols(params["wmean"]).astype(head_dtype)],
        axis=0,
    )                                                        # (3, nhid1, nfeat_pad)
    bh = jnp.stack(
        [pad_cols(params["bpi"]), pad_cols(params["bvar"]), pad_cols(params["bmean"])],
        axis=0,
    ).astype(jnp.float32)                                    # (3, 1, nfeat_pad)

    # ---- Stage 1: its own tiny pallas_call (x stays in float32).
    x = pl.pallas_call(
        stage1_kernel,
        out_shape=jax.ShapeDtypeStruct((B, nhid1), jnp.float32),
        grid_spec=pltpu.PrefetchScalarGridSpec(
            num_scalar_prefetch=0,
            grid=(1,),
            in_specs=[
                pl.BlockSpec((B, nhid2), lambda i: (0, 0)),
                pl.BlockSpec((nhid2, nhid1), lambda i: (0, 0)),
                pl.BlockSpec((1, nhid1), lambda i: (0, 0)),
                pl.BlockSpec((1, nhid1), lambda i: (0, 0)),
                pl.BlockSpec((1, nhid1), lambda i: (0, 0)),
            ],
            out_specs=pl.BlockSpec((B, nhid1), lambda i: (0, 0)),
        ),
        compiler_params=pltpu.CompilerParams(
            dimension_semantics=("arbitrary",)),
    )(emb, params["w1"], params["b1"], params["gamma"], params["beta"])

    # ---- Heads: 2-D grid (head, column tile).  No cross-step dependency, so
    #      both axes are "parallel" (v7x 2-TC sharding).  Weight tiles are
    #      double-buffered by BlockSpec; x has a constant index map and stays
    #      resident in VMEM.
    out = pl.pallas_call(
        head_kernel,
        out_shape=jax.ShapeDtypeStruct((3, B, nfeat_pad), jnp.float32),
        grid_spec=pltpu.PrefetchScalarGridSpec(
            num_scalar_prefetch=0,
            grid=(3, tiles_per_head),
            in_specs=[
                pl.BlockSpec((B, nhid1), lambda h, j: (0, 0)),            # x (resident)
                pl.BlockSpec((None, nhid1, TN), lambda h, j: (h, 0, j)),  # fused W tile
                pl.BlockSpec((None, 1, TN), lambda h, j: (h, 0, j)),      # fused b tile
            ],
            out_specs=pl.BlockSpec((None, B, TN), lambda h, j: (h, 0, j)),
        ),
        compiler_params=pltpu.CompilerParams(
            dimension_semantics=("parallel", "parallel"),
            vmem_limit_bytes=int(vmem_limit),
        ),
    )(x, wh, bh)

    # Per-head results; only the (usually empty) lane-padding strip is trimmed.
    pi = out[0, :, :nfeat]
    var = out[1, :, :nfeat]
    mean = out[2, :, :nfeat]
    return [pi, var, mean]


def init_params(key, nfeat, nhid1, nhid2):
    """Deterministic synthetic parameters matching the PyTorch module shapes.
    Linear weights stored transposed as (in_features, out_features)."""
    ks = jax.random.split(key, 8)

    def lin(kw, kb, fan_in, fan_out):
        bound = 1.0 / jnp.sqrt(fan_in)
        w = jax.random.uniform(kw, (fan_in, fan_out), jnp.float32, -bound, bound)
        b = jax.random.uniform(kb, (1, fan_out), jnp.float32, -bound, bound)
        return w, b

    w1, b1 = lin(ks[0], ks[1], nhid2, nhid1)
    wpi, bpi = lin(ks[2], ks[3], nhid1, nfeat)
    wvar, bvar = lin(ks[4], ks[5], nhid1, nfeat)
    wmean, bmean = lin(ks[6], ks[7], nhid1, nfeat)

    return {
        "w1": w1, "b1": b1,
        "gamma": jnp.ones((1, nhid1), jnp.float32),   # BatchNorm1d weight init
        "beta": jnp.zeros((1, nhid1), jnp.float32),   # BatchNorm1d bias init
        "wpi": wpi, "bpi": bpi,
        "wvar": wvar, "bvar": bvar,
        "wmean": wmean, "bmean": bmean,
    }


def decoder_reference(emb, params):
    """Pure-JAX f32 reference reproducing the PyTorch forward."""
    h = emb @ params["w1"] + params["b1"]
    mu = jnp.mean(h, axis=0, keepdims=True)
    v = jnp.mean((h - mu) ** 2, axis=0, keepdims=True)
    x = jnp.maximum(
        (h - mu) / jnp.sqrt(v + BN_EPS) * params["gamma"] + params["beta"], 0.0
    )
    pi = jax.nn.sigmoid(x @ params["wpi"] + params["bpi"])
    var = jnp.clip(jax.nn.softplus(x @ params["wvar"] + params["bvar"]), 1e-4, 1e4)
    mean = jnp.clip(jnp.exp(x @ params["wmean"] + params["bmean"]), 1e-5, 1e6)
    return [pi, var, mean]


if __name__ == "__main__":
    # Small shapes: batch=8, nfeat=32, nhid1=64, nhid2=16
    B, nfeat, nhid1, nhid2 = 8, 32, 64, 16

    key = jax.random.PRNGKey(0)
    k_emb, k_par = jax.random.split(key)
    emb = jax.random.normal(k_emb, (B, nhid2), jnp.float32)
    params = init_params(k_par, nfeat, nhid1, nhid2)

    pi_r, var_r, mean_r = decoder_reference(emb, params)

    # 1) exact-precision path (f32 head weights): must match the reference
    #    tightly -> validates semantics.
    pi32, var32, mean32 = decoder_forward(emb, params, head_dtype=jnp.float32)
    jax.block_until_ready((pi32, var32, mean32))
    assert jnp.allclose(pi32, pi_r, atol=2e-5, rtol=2e-5)
    assert jnp.allclose(var32, var_r, atol=2e-5, rtol=2e-5)
    assert jnp.allclose(mean32, mean_r, atol=1e-4, rtol=1e-4)

    # 2) default bandwidth-optimized path (bf16 head weights; x cast to bf16
    #    only at the MXU input; f32 accumulate + f32 epilogue).  Looser
    #    tolerance only reflects the bf16 quantization of the MXU inputs.
    pi, var, mean = decoder_forward(emb, params)
    jax.block_until_ready((pi, var, mean))
    assert jnp.allclose(pi, pi_r, atol=5e-2, rtol=5e-2)
    assert jnp.allclose(var, var_r, atol=5e-2, rtol=5e-2)
    assert jnp.allclose(mean, mean_r, atol=5e-2, rtol=5e-2)

    print("KERNEL_OK")
</pallas_src>

<mosaic_0001>
module attributes {stable_mosaic.version = 11 : i64} {
  func.func @stage1_kernel(%arg0: i32, %arg1: memref<8x16xf32, #tpu.memory_space<vmem>>, %arg2: memref<16x64xf32, #tpu.memory_space<vmem>>, %arg3: memref<1x64xf32, #tpu.memory_space<vmem>>, %arg4: memref<1x64xf32, #tpu.memory_space<vmem>>, %arg5: memref<1x64xf32, #tpu.memory_space<vmem>>, %arg6: memref<8x64xf32, #tpu.memory_space<vmem>>) attributes {dimension_semantics = [#tpu.dimension_semantics<arbitrary>], iteration_bounds = array<i64: 1>, scalar_prefetch = 0 : i64, scratch_operands = 0 : i64, tpu.core_type = #tpu.core_type<tc>, window_params = [{pipeline_mode = #tpu.pipeline_mode<synchronous>, transform_indices = @transform_0, window_bounds = array<i64: 8, 16>}, {pipeline_mode = #tpu.pipeline_mode<synchronous>, transform_indices = @transform_1, window_bounds = array<i64: 16, 64>}, {pipeline_mode = #tpu.pipeline_mode<synchronous>, transform_indices = @transform_2, window_bounds = array<i64: 1, 64>}, {pipeline_mode = #tpu.pipeline_mode<synchronous>, transform_indices = @transform_3, window_bounds = array<i64: 1, 64>}, {pipeline_mode = #tpu.pipeline_mode<synchronous>, transform_indices = @transform_4, window_bounds = array<i64: 1, 64>}, {pipeline_mode = #tpu.pipeline_mode<synchronous>, transform_indices = @transform_5, window_bounds = array<i64: 8, 64>}]} {
    %c0 = arith.constant 0 : index
    %c0_0 = arith.constant 0 : index
    %0 = vector.load %arg1[%c0, %c0_0] : memref<8x16xf32, #tpu.memory_space<vmem>>, vector<8x16xf32>
    %c0_1 = arith.constant 0 : index
    %c0_2 = arith.constant 0 : index
    %1 = vector.load %arg2[%c0_1, %c0_2] : memref<16x64xf32, #tpu.memory_space<vmem>>, vector<16x64xf32>
    %cst = arith.constant dense<0.000000e+00> : vector<8x64xf32>
    %2 = tpu.matmul %0, %1, %cst {dimension_numbers = #tpu.dot_dimension_numbers<[1], [0], [0], [1], [0, 0, 1, 1], [], []>} : vector<8x16xf32>, vector<16x64xf32>, vector<8x64xf32> -> vector<8x64xf32>
    %c0_3 = arith.constant 0 : index
    %c0_4 = arith.constant 0 : index
    %3 = vector.load %arg3[%c0_3, %c0_4] : memref<1x64xf32, #tpu.memory_space<vmem>>, vector<1x64xf32>
    %4 = vector.broadcast %3 : vector<1x64xf32> to vector<8x64xf32>
    %5 = arith.addf %2, %4 : vector<8x64xf32>
    %cst_5 = arith.constant dense<0.000000e+00> : vector<64xf32>
    %6 = vector.multi_reduction <add>, %5, %cst_5 [0] : vector<8x64xf32> to vector<64xf32>
    %7 = vector.shape_cast %6 : vector<64xf32> to vector<1x64xf32>
    %cst_6 = arith.constant 8.000000e+00 : f32
    %8 = vector.broadcast %cst_6 : f32 to vector<1x64xf32>
    %9 = arith.divf %7, %8 : vector<1x64xf32>
    %10 = vector.broadcast %9 : vector<1x64xf32> to vector<8x64xf32>
    %11 = arith.subf %5, %10 : vector<8x64xf32>
    %12 = arith.mulf %11, %11 : vector<8x64xf32>
    %cst_7 = arith.constant dense<0.000000e+00> : vector<64xf32>
    %13 = vector.multi_reduction <add>, %12, %cst_7 [0] : vector<8x64xf32> to vector<64xf32>
    %14 = vector.shape_cast %13 : vector<64xf32> to vector<1x64xf32>
    %cst_8 = arith.constant 8.000000e+00 : f32
    %15 = vector.broadcast %cst_8 : f32 to vector<1x64xf32>
    %16 = arith.divf %14, %15 : vector<1x64xf32>
    %c0_9 = arith.constant 0 : index
    %c0_10 = arith.constant 0 : index
    %17 = vector.load %arg4[%c0_9, %c0_10] : memref<1x64xf32, #tpu.memory_space<vmem>>, vector<1x64xf32>
    %cst_11 = arith.constant 9.99999974E-6 : f32
    %18 = vector.broadcast %cst_11 : f32 to vector<1x64xf32>
    %19 = arith.addf %16, %18 : vector<1x64xf32>
    %20 = math.rsqrt %19 : vector<1x64xf32>
    %21 = arith.mulf %17, %20 : vector<1x64xf32>
    %c0_12 = arith.constant 0 : index
    %c0_13 = arith.constant 0 : index
    %22 = vector.load %arg5[%c0_12, %c0_13] : memref<1x64xf32, #tpu.memory_space<vmem>>, vector<1x64xf32>
    %23 = arith.mulf %9, %21 : vector<1x64xf32>
    %24 = arith.subf %22, %23 : vector<1x64xf32>
    %25 = vector.broadcast %21 : vector<1x64xf32> to vector<8x64xf32>
    %26 = arith.mulf %5, %25 : vector<8x64xf32>
    %27 = vector.broadcast %24 : vector<1x64xf32> to vector<8x64xf32>
    %28 = arith.addf %26, %27 : vector<8x64xf32>
    %cst_14 = arith.constant 0.000000e+00 : f32
    %29 = vector.broadcast %cst_14 : f32 to vector<8x64xf32>
    %30 = arith.maximumf %28, %29 : vector<8x64xf32>
    %c0_15 = arith.constant 0 : index
    %c0_16 = arith.constant 0 : index
    %31 = vector.load %arg6[%c0_15, %c0_16] : memref<8x64xf32, #tpu.memory_space<vmem>>, vector<8x64xf32>
    tpu.vector_store %arg6[%c0_15, %c0_16], %30 {strides = array<i32>} : memref<8x64xf32, #tpu.memory_space<vmem>>, vector<8x64xf32>,
    return
  }
  func.func @transform_0(%arg0: i32) -> (i32, i32) {
    %c0_i32 = arith.constant 0 : i32
    %c0_i32_0 = arith.constant 0 : i32
    %c0_i32_1 = arith.constant 0 : i32
    return %c0_i32, %c0_i32_0 : i32, i32
  }
  func.func @transform_1(%arg0: i32) -> (i32, i32) {
    %c0_i32 = arith.constant 0 : i32
    %c0_i32_0 = arith.constant 0 : i32
    %c0_i32_1 = arith.constant 0 : i32
    return %c0_i32, %c0_i32_0 : i32, i32
  }
  func.func @transform_2(%arg0: i32) -> (i32, i32) {
    %c0_i32 = arith.constant 0 : i32
    %c0_i32_0 = arith.constant 0 : i32
    %c0_i32_1 = arith.constant 0 : i32
    return %c0_i32, %c0_i32_0 : i32, i32
  }
  func.func @transform_3(%arg0: i32) -> (i32, i32) {
    %c0_i32 = arith.constant 0 : i32
    %c0_i32_0 = arith.constant 0 : i32
    %c0_i32_1 = arith.constant 0 : i32
    return %c0_i32, %c0_i32_0 : i32, i32
  }
  func.func @transform_4(%arg0: i32) -> (i32, i32) {
    %c0_i32 = arith.constant 0 : i32
    %c0_i32_0 = arith.constant 0 : i32
    %c0_i32_1 = arith.constant 0 : i32
    return %c0_i32, %c0_i32_0 : i32, i32
  }
  func.func @transform_5(%arg0: i32) -> (i32, i32) {
    %c0_i32 = arith.constant 0 : i32
    %c0_i32_0 = arith.constant 0 : i32
    %c0_i32_1 = arith.constant 0 : i32
    return %c0_i32, %c0_i32_0 : i32, i32
  }
}

module attributes {stable_mosaic.version = 11 : i64} {
  func.func @head_kernel(%arg0: i32, %arg1: i32, %arg2: memref<8x64xf32, #tpu.memory_space<vmem>>, %arg3: memref<1x64x128xf32, #tpu.memory_space<vmem>>, %arg4: memref<1x1x128xf32, #tpu.memory_space<vmem>>, %arg5: memref<1x8x128xf32, #tpu.memory_space<vmem>>) attributes {dimension_semantics = [#tpu.dimension_semantics<parallel>, #tpu.dimension_semantics<parallel>], iteration_bounds = array<i64: 3, 1>, scalar_prefetch = 0 : i64, scratch_operands = 0 : i64, tpu.core_type = #tpu.core_type<tc>, window_params = [{pipeline_mode = #tpu.pipeline_mode<synchronous>, transform_indices = @transform_0, window_bounds = array<i64: 8, 64>}, {transform_indices = @transform_1, window_bounds = array<i64: 1, 64, 128>}, {transform_indices = @transform_2, window_bounds = array<i64: 1, 1, 128>}, {transform_indices = @transform_3, window_bounds = array<i64: 1, 8, 128>}]} {
    %c0 = arith.constant 0 : index
    %c0_0 = arith.constant 0 : index
    %0 = vector.load %arg2[%c0, %c0_0] : memref<8x64xf32, #tpu.memory_space<vmem>>, vector<8x64xf32>
    %c0_1 = arith.constant 0 : index
    %c0_2 = arith.constant 0 : index
    %c0_3 = arith.constant 0 : index
    %1 = vector.load %arg3[%c0_1, %c0_2, %c0_3] : memref<1x64x128xf32, #tpu.memory_space<vmem>>, vector<1x64x128xf32>
    %2 = vector.shape_cast %1 : vector<1x64x128xf32> to vector<64x128xf32>
    %cst = arith.constant dense<0.000000e+00> : vector<8x128xf32>
    %3 = tpu.matmul %0, %2, %cst {dimension_numbers = #tpu.dot_dimension_numbers<[1], [0], [0], [1], [0, 0, 1, 1], [], []>} : vector<8x64xf32>, vector<64x128xf32>, vector<8x128xf32> -> vector<8x128xf32>
    %c0_4 = arith.constant 0 : index
    %c0_5 = arith.constant 0 : index
    %c0_6 = arith.constant 0 : index
    %4 = vector.load %arg4[%c0_4, %c0_5, %c0_6] : memref<1x1x128xf32, #tpu.memory_space<vmem>>, vector<1x1x128xf32>
    %5 = vector.shape_cast %4 : vector<1x1x128xf32> to vector<1x128xf32>
    %6 = vector.broadcast %5 : vector<1x128xf32> to vector<8x128xf32>
    %7 = arith.addf %3, %6 : vector<8x128xf32>
    %c0_i32 = arith.constant 0 : i32
    %8 = arith.cmpi eq, %arg0, %c0_i32 : i32
    %9 = arith.extui %8 : i1 to i32
    %c0_i32_7 = arith.constant 0 : i32
    %10 = arith.cmpi ne, %9, %c0_i32_7 : i32
    scf.if %10 {
      %17 = math.absf %7 : vector<8x128xf32>
      %cst_10 = arith.constant 0.000000e+00 : f32
      %18 = vector.broadcast %cst_10 : f32 to vector<8x128xf32>
      %19 = arith.subf %18, %17 : vector<8x128xf32>
      %20 = math.exp %19 : vector<8x128xf32>
      %cst_11 = arith.constant 0.000000e+00 : f32
      %21 = vector.broadcast %cst_11 : f32 to vector<8x128xf32>
      %22 = arith.cmpf oge, %7, %21 : vector<8x128xf32>
      %cst_12 = arith.constant 1.000000e+00 : f32
      %23 = vector.broadcast %cst_12 : f32 to vector<8x128xf32>
      %24 = arith.select %22, %23, %20 : vector<8x128xi1>, vector<8x128xf32>
      %cst_13 = arith.constant 1.000000e+00 : f32
      %25 = vector.broadcast %cst_13 : f32 to vector<8x128xf32>
      %26 = arith.addf %25, %20 : vector<8x128xf32>
      %27 = tpu.reciprocal %26 {approx = true} : vector<8x128xf32> -> vector<8x128xf32>
      %28 = arith.mulf %26, %27 : vector<8x128xf32>
      %cst_14 = arith.constant 2.000000e+00 : f32
      %29 = vector.broadcast %cst_14 : f32 to vector<8x128xf32>
      %30 = arith.subf %29, %28 : vector<8x128xf32>
      %31 = arith.mulf %27, %30 : vector<8x128xf32>
      %32 = arith.mulf %24, %31 : vector<8x128xf32>
      %c0_15 = arith.constant 0 : index
      %c0_16 = arith.constant 0 : index
      %c0_17 = arith.constant 0 : index
      %33 = vector.load %arg5[%c0_15, %c0_16, %c0_17] : memref<1x8x128xf32, #tpu.memory_space<vmem>>, vector<1x8x128xf32>
      %34 = vector.shape_cast %33 : vector<1x8x128xf32> to vector<8x128xf32>
      %35 = vector.shape_cast %32 : vector<8x128xf32> to vector<1x8x128xf32>
      tpu.vector_store %arg5[%c0_15, %c0_16, %c0_17], %35 {strides = array<i32>} : memref<1x8x128xf32, #tpu.memory_space<vmem>>, vector<1x8x128xf32>,
    } else {
    }
    %c1_i32 = arith.constant 1 : i32
    %11 = arith.cmpi eq, %arg0, %c1_i32 : i32
    %12 = arith.extui %11 : i1 to i32
    %c0_i32_8 = arith.constant 0 : i32
    %13 = arith.cmpi ne, %12, %c0_i32_8 : i32
    scf.if %13 {
      %cst_10 = arith.constant 0.000000e+00 : f32
      %17 = vector.broadcast %cst_10 : f32 to vector<8x128xf32>
      %18 = arith.maximumf %7, %17 : vector<8x128xf32>
      %19 = math.absf %7 : vector<8x128xf32>
      %cst_11 = arith.constant 0.000000e+00 : f32
      %20 = vector.broadcast %cst_11 : f32 to vector<8x128xf32>
      %21 = arith.subf %20, %19 : vector<8x128xf32>
      %22 = math.exp %21 : vector<8x128xf32>
      %23 = math.log1p %22 : vector<8x128xf32>
      %24 = arith.addf %18, %23 : vector<8x128xf32>
      %cst_12 = arith.constant 9.99999974E-5 : f32
      %cst_13 = arith.constant 1.000000e+04 : f32
      %25 = vector.broadcast %cst_12 : f32 to vector<8x128xf32>
      %26 = arith.maximumf %25, %24 : vector<8x128xf32>
      %27 = vector.broadcast %cst_13 : f32 to vector<8x128xf32>
      %28 = arith.minimumf %27, %26 : vector<8x128xf32>
      %c0_14 = arith.constant 0 : index
      %c0_15 = arith.constant 0 : index
      %c0_16 = arith.constant 0 : index
      %29 = vector.load %arg5[%c0_14, %c0_15, %c0_16] : memref<1x8x128xf32, #tpu.memory_space<vmem>>, vector<1x8x128xf32>
      %30 = vector.shape_cast %29 : vector<1x8x128xf32> to vector<8x128xf32>
      %31 = vector.shape_cast %28 : vector<8x128xf32> to vector<1x8x128xf32>
      tpu.vector_store %arg5[%c0_14, %c0_15, %c0_16], %31 {strides = array<i32>} : memref<1x8x128xf32, #tpu.memory_space<vmem>>, vector<1x8x128xf32>,
    } else {
    }
    %c2_i32 = arith.constant 2 : i32
    %14 = arith.cmpi eq, %arg0, %c2_i32 : i32
    %15 = arith.extui %14 : i1 to i32
    %c0_i32_9 = arith.constant 0 : i32
    %16 = arith.cmpi ne, %15, %c0_i32_9 : i32
    scf.if %16 {
      %17 = math.exp %7 : vector<8x128xf32>
      %cst_10 = arith.constant 9.99999974E-6 : f32
      %cst_11 = arith.constant 1.000000e+06 : f32
      %18 = vector.broadcast %cst_10 : f32 to vector<8x128xf32>
      %19 = arith.maximumf %18, %17 : vector<8x128xf32>
      %20 = vector.broadcast %cst_11 : f32 to vector<8x128xf32>
      %21 = arith.minimumf %20, %19 : vector<8x128xf32>
      %c0_12 = arith.constant 0 : index
      %c0_13 = arith.constant 0 : index
      %c0_14 = arith.constant 0 : index
      %22 = vector.load %arg5[%c0_12, %c0_13, %c0_14] : memref<1x8x128xf32, #tpu.memory_space<vmem>>, vector<1x8x128xf32>
      %23 = vector.shape_cast %22 : vector<1x8x128xf32> to vector<8x128xf32>
      %24 = vector.shape_cast %21 : vector<8x128xf32> to vector<1x8x128xf32>
      tpu.vector_store %arg5[%c0_12, %c0_13, %c0_14], %24 {strides = array<i32>} : memref<1x8x128xf32, #tpu.memory_space<vmem>>, vector<1x8x128xf32>,
    } else {
    }
    return
  }
  func.func @transform_0(%arg0: i32, %arg1: i32) -> (i32, i32) {
    %c0_i32 = arith.constant 0 : i32
    %c0_i32_0 = arith.constant 0 : i32
    %c0_i32_1 = arith.constant 0 : i32
    return %c0_i32, %c0_i32_0 : i32, i32
  }
  func.func @transform_1(%arg0: i32, %arg1: i32) -> (i32, i32, i32) {
    %c0_i32 = arith.constant 0 : i32
    %c0_i32_0 = arith.constant 0 : i32
    return %arg0, %c0_i32, %arg1 : i32, i32, i32
  }
  func.func @transform_2(%arg0: i32, %arg1: i32) -> (i32, i32, i32) {
    %c0_i32 = arith.constant 0 : i32
    %c0_i32_0 = arith.constant 0 : i32
    return %arg0, %c0_i32, %arg1 : i32, i32, i32
  }
  func.func @transform_3(%arg0: i32, %arg1: i32) -> (i32, i32, i32) {
    %c0_i32 = arith.constant 0 : i32
    %c0_i32_0 = arith.constant 0 : i32
    return %arg0, %c0_i32, %arg1 : i32, i32, i32
  }
}

</mosaic_0001>

<bundles_post_ra>
// kernel: decoder_forward.3
= control target key start
LH: loop header
LB: loop body
LE: loop exit
PB: predicated region body
PF: predicated region fallthrough
CT: control target
= control target key end

     0   :  { %s578_s12 = smov 0   ;;  %s580_s13 = smov 0   ;;  %s634_s0 = inlined_call_operand.vmem [shape: f32[8,64], index: 0, kind: input, shape index: {}]   ;;  %s635_s1 = inlined_call_operand.vmem [shape: f32[3,64,128], index: 1, kind: input, shape index: {}]   ;;  %s636_s2 = inlined_call_operand.vmem [shape: f32[3,1,128], index: 2, kind: input, shape index: {}]   ;;  %s637_s3 = inlined_call_operand.vmem [shape: f32[3,8,128], index: 3, kind: output, shape index: {}]  }
   0x1   :  { %s582_s14 = smov 0  }
   0x2 LB: > { %s25_s15 = sadd.s32 1, %s550_s13  ;;  %p456_p0 = scmp.ge.s32.totalorder %s554_s14, 1  ;;  %s554_s14 = sphi %s582_s14, %s13_s14   ;;  %s550_s13 = sphi %s580_s13, %s639_s13   ;;  %s546_s12 = sphi %s578_s12, %s638_s12  }
   0x3   : > { %p27_p1 = scmp.ge.s32.totalorder %s25_s15, 3  ;;  %p169_p2 = scmp.lt.s32.totalorder %s554_s14, 4 }
   0x5   : > { %s641_s15 = smov (%p27_p1, %s25_s15), 0  ;;  %p170_p3 = pnand %p456_p0, %p169_p2 }
   0x6   : > { %p204_p4 = scmp.lt.s32.totalorder (!%p170_p3), %s546_s12, 2  ;;  %p462_p5 = scmp.ne.s32.totalorder (!%p170_p3), %s546_s12, 0 }
   0x7   : > { %173 = sbr.rel (%p170_p3) target bundleno = 353 (0x161), region = 32 }
   0xc   : > { %v556_v0 = vmov 0.0   ;;  %vm557_vm0 = vmmov 0   ;;  %s600_s16 = scalar_select %p204_p4, %s546_s12, 2  ;;  %v225_v9 = vld [vmem:[%s634_s0] sm:$0xff]  ;;  %vm241_vm1 = vcmask 523264  }
   0xd   : > { %477 = vmatprep.subr.mxu0 %v556_v0  ;;  %493 = vmatprep.mubr.msk.f32.mxu0 %vm557_vm0, %v556_v0 }
   0xe   : > { %s467_s17 = sshll.u32 %s600_s16, 6  ;;  %s459_s18 = sshll.u32 %s600_s16, 3 }
   0xf   : > { %s211_s21 = scalar_lea.vmem %s635_s1, %s467_s17  ;;  %s610_s24 = scalar_lea.vmem %s637_s3, %s459_s18 }
  0x10   : > { %v233_v1 = vld [vmem:[%s211_s21 + $0x38] sm:$0xff]  ;;  %v232_v2 = vld [vmem:[%s211_s21 + $0x30] sm:$0xff]  ;;  %v231_v3 = vld [vmem:[%s211_s21 + $0x28] sm:$0xff]  ;;  %s217_s29 = scalar_lea.vmem %s636_s2, %s600_s16 }
  0x11   : > { %478 = vmatpush3.msra.mxu0 %v233_v1  ;;  %v230_v4 = vld [vmem:[%s211_s21 + $0x20] sm:$0xff]  ;;  %v229_v5 = vld [vmem:[%s211_s21 + $0x18] sm:$0xff]  ;;  %v228_v6 = vld [vmem:[%s211_s21 + $0x10] sm:$0xff] }
  0x12   : > { %479 = vmatprep.subr.mxu0 %v556_v0  ;;  %v227_v7 = vld [vmem:[%s211_s21 + $0x8] sm:$0xff]  ;;  %v226_v8 = vld [vmem:[%s211_s21] sm:$0xff] }
  0x13   : > { %480 = vmatpush3.msra.mxu0 %v232_v2  ;;  %v460_v10 = vld [vmem:[%s217_s29] ss:$0 sm:$0xff] }
  0x14   : > { %481 = vmatprep.subr.mxu0 %v556_v0 }
  0x15   : > { %482 = vmatpush3.msra.mxu0 %v231_v3 }
  0x16   : > { %483 = vmatprep.subr.mxu0 %v556_v0 }
  0x17   : > { %484 = vmatpush3.msra.mxu0 %v230_v4 }
  0x18   : > { %485 = vmatprep.subr.mxu0 %v556_v0 }
  0x19   : > { %486 = vmatpush3.msra.mxu0 %v229_v5 }
  0x1a   : > { %487 = vmatprep.subr.mxu0 %v556_v0 }
  0x1b   : > { %488 = vmatpush3.msra.mxu0 %v228_v6 }
  0x1c   : > { %489 = vmatprep.subr.mxu0 %v556_v0 }
  0x1d   : > { %490 = vmatpush3.msra.mxu0 %v227_v7 }
  0x1e   : > { %491 = vmatprep.subr.mxu0 %v556_v0 }
  0x1f   : > { %492 = vmatpush3.msra.mxu0 %v226_v8 }
  0x20   : > { %494 = vmatmul.mubr.msk.f32.vlgmr.msra.gmra.mxu0 %vm241_vm1, %v225_v9 }
  0xde   : > { %318 = sbr.rel (%p462_p5) target bundleno = 272 (0x110), region = 36 }
  0xe0   : > { %v311_v11 = vpop.f32.mrf.mxu0 }
  0xe1   : > { %v312_v12 = vadd.f32 %v460_v10, %v311_v11 }
  0xe2   : > { %v495_v13 = vpop.f32.mrf.mxu0 }
  0xe3   : > { %v319_v14 = vand.u32 2147483647, %v312_v12  ;;  %vm323_vm2 = vcmp.ge.f32.partialorder %v312_v12, 0.0 }
  0xe5   : > { %v320_v15 = vsub.f32 0.0, %v319_v14 }
  0xe7   : > { %v321_v16 = vmul.f32 1.442695, %v320_v15 }
  0xe9   : > { %522 = vpow2.f32 %v321_v16 }
  0xf6   : > { %v523_v17 = vpop.eup %522 }
  0xf7   : > { %v325_v18 = vadd.f32 1.0, %v523_v17  ;;  %v324_v22 = vsel %vm323_vm2, 1.0, %v523_v17 }
  0xf9   : > { %524 = vrcp.f32 %v325_v18 }
 0x106   : > { %v525_v19 = vpop.eup %524 }
 0x107   : > { %v327_v20 = vmul.f32 %v525_v19, %v325_v18 }
 0x109   : > { %v328_v21 = vsub.f32 2.0, %v327_v20 }
 0x10b   : > { %v329_v23 = vmul.f32 %v525_v19, %v328_v21 }
 0x10d   : > { %v330_v24 = vmul.f32 %v329_v23, %v324_v22 }
 0x10f   : > { %331 = vst [vmem:[%s610_s24] sm:$0xff] %v330_v24 }
 0x110 PF: > { %p463_p6 = scmp.ne.s32.totalorder %s546_s12, 1 }
 0x112   : > { %335 = sbr.rel (%p463_p6) target bundleno = 325 (0x145), region = 40 }
 0x117   : > { %v337_v25 = vand.u32 2147483647, %v312_v12  ;;  %v336_v35 = vmax.f32 %v312_v12, 0.0 }
 0x119   : > { %v338_v26 = vsub.f32 0.0, %v337_v25 }
 0x11b   : > { %v339_v27 = vmul.f32 1.442695, %v338_v26 }
 0x11d   : > { %526 = vpow2.f32 %v339_v27 }
 0x12a   : > { %v527_v28 = vpop.eup %526 }
 0x12b   : > { %v341_v29 = vadd.f32 1.0, %v527_v28  ;;  %v344_v30 = vmul.f32 -0.5, %v527_v28  ;;  %v347_v32 = vand.u32 2147483647, %v527_v28 }
 0x12d   : > { %528 = vlog2.f32 %v341_v29  ;;  %v345_v31 = vadd.f32 1.0, %v344_v30  ;;  %vm348_vm3 = vcmp.lt.f32.partialorder %v347_v32, 0.0004427343 }
 0x12f   : > { %v346_v33 = vmul.f32 %v527_v28, %v345_v31 }
 0x13a   : > { %v529_v34 = vpop.eup %528 }
 0x13b   : > { %v343_v36 = vmul.f32 0.6931472, %v529_v34 }
 0x13d   : > { %v349_v37 = vsel %vm348_vm3, %v346_v33, %v343_v36 }
 0x13e   : > { %v350_v38 = vadd.f32 %v349_v37, %v336_v35 }
 0x140   : > { %v351_v39 = vmax.f32 %v350_v38, 0.0001 }
 0x142   : > { %v352_v40 = vmin.f32 %v351_v39, 10000.0 }
 0x144   : > { %353 = vst [vmem:[%s610_s24] sm:$0xff] %v352_v40 }
 0x145 PF: > { %p464_p7 = scmp.ne.s32.totalorder %s546_s12, 2 }
 0x147   : > { %357 = sbr.rel (%p464_p7) target bundleno = 353 (0x161), region = 44 }
 0x14c   : > { %v358_v41 = vmul.f32 1.442695, %v312_v12 }
 0x14e   : > { %530 = vpow2.f32 %v358_v41 }
 0x15b   : > { %v531_v42 = vpop.eup %530 }
 0x15c   : > { %v360_v43 = vmax.f32 %v531_v42, 1e-05 }
 0x15e   : > { %v361_v44 = vmin.f32 %v360_v43, 1000000.0 }
 0x160   : > { %362 = vst [vmem:[%s610_s24] sm:$0xff] %v361_v44 }
 0x161 PF: > { %s13_s14 = sadd.s32 1, %s554_s14   ;;  %s638_s12 = smov %s550_s13 }
 0x162   : > { %p10_p8 = scmp.ge.s32.totalorder %s13_s14, 5   ;;  %s639_s13 = smov %s641_s15 }
 0x164   :  { %12 = sbr.rel (!%p10_p8) target bundleno = 2 (0x2), region = 77 }

// kernel: decoder_forward.2
= control target key start
LH: loop header
LB: loop body
LE: loop exit
PB: predicated region body
PF: predicated region fallthrough
CT: control target
= control target key end

     0   :  { %v167_v0 = vmov 0.0   ;;  %vm168_vm0 = vmmov 0   ;;  %vm30_vm1 = vcmask 130048   ;;  %vm104_vm2 = vcmask 523264   ;;  %s223_s1 = inlined_call_operand.vmem [shape: f32[16,64], index: 1, kind: input, shape index: {}]   ;;  %s224_s0 = inlined_call_operand.vmem [shape: f32[8,16], index: 0, kind: input, shape index: {}]   ;;  %s225_s2 = inlined_call_operand.vmem [shape: f32[1,64], index: 2, kind: input, shape index: {}]   ;;  %s226_s3 = inlined_call_operand.vmem [shape: f32[1,64], index: 3, kind: input, shape index: {}]   ;;  %s227_s4 = inlined_call_operand.vmem [shape: f32[1,64], index: 4, kind: input, shape index: {}]   ;;  %s228_s5 = inlined_call_operand.vmem [shape: f32[8,64], index: 5, kind: output, shape index: {}]  }
   0x1   :  { %156 = vmatprep.subr.mxu0 %v167_v0  ;;  %v22_v1 = vld [vmem:[%s223_s1 + $0x8] sm:$0xff]  ;;  %v21_v2 = vld [vmem:[%s223_s1] sm:$0xff]  ;;  %160 = vmatprep.mubr.msk.f32.mxu0 %vm168_vm0, %v167_v0  ;;  %v132_v27 = vlaneseq }
   0x2   :  { %157 = vmatpush3.msra.mxu0 %v22_v1  ;;  %v20_v3 = vld [vmem:[%s224_s0] sm:$0xff] }
   0x3   :  { %158 = vmatprep.subr.mxu0 %v167_v0  ;;  %v151_v4 = vld [vmem:[%s225_s2] ss:$0 sm:$0xff]  ;;  %v133_v28 = vshrl.u32 %v132_v27, 7 }
   0x4   :  { %159 = vmatpush3.msra.mxu0 %v21_v2  ;;  %v124_v29 = vld [vmem:[%s226_s3] sm:$0x1] }
   0x5   :  { %161 = vmatmul.mubr.msk.f32.vlgmr.msra.gmra.mxu0 %vm30_vm1, %v20_v3  ;;  %v134_v30 = vsub.s32 0, %v133_v28  ;;  %v128_v33 = vld [vmem:[%s227_s4] sm:$0x1] }
  0xc5   :  { %v100_v5 = vpop.f32.mrf.mxu0 }
  0xc6   :  { %v101_v6 = vadd.f32 %v151_v4, %v100_v5 }
  0xc7   :  { %v162_v7 = vpop.f32.mrf.mxu0 }
  0xc8   :  { %v105_v8 = vsel %vm104_vm2, %v101_v6, 0.0 }
  0xc9   :  { %v106_v9 = vrot.slane %v105_v8, 4 }
  0xcb   :  { %v107_v10 = vadd.f32 %v106_v9, %v105_v8 }
  0xcd   :  { %v108_v11 = vrot.slane %v107_v10, 2 }
  0xcf   :  { %v109_v12 = vadd.f32 %v108_v11, %v107_v10 }
  0xd1   :  { %v110_v13 = vrot.slane %v109_v12, 1 }
  0xd3   :  { %v111_v14 = vadd.f32 %v110_v13, %v109_v12 }
  0xd5   :  { %v113_v15 = vmul.f32 0.125, %v111_v14 }
  0xd7   :  { %v114_v16 = vsub.f32 %v101_v6, %v113_v15 }
  0xd9   :  { %v115_v17 = vmul.f32 %v114_v16, %v114_v16 }
  0xdb   :  { %v116_v18 = vsel %vm104_vm2, %v115_v17, 0.0 }
  0xdc   :  { %v117_v19 = vrot.slane %v116_v18, 4 }
  0xde   :  { %v118_v20 = vadd.f32 %v117_v19, %v116_v18 }
  0xe0   :  { %v119_v21 = vrot.slane %v118_v20, 2 }
  0xe2   :  { %v120_v22 = vadd.f32 %v119_v21, %v118_v20 }
  0xe4   :  { %v121_v23 = vrot.slane %v120_v22, 1 }
  0xe6   :  { %v122_v24 = vadd.f32 %v121_v23, %v120_v22 }
  0xe8   :  { %v123_v25 = vmul.f32 0.125, %v122_v24 }
  0xea   :  { %v125_v26 = vadd.f32 1e-05, %v123_v25 }
  0xec   :  { %165 = vrsqrt.f32 %v125_v26 }
  0xf9   :  { %v166_v31 = vpop.eup %165 }
  0xfa   :  { %v127_v32 = vmul.f32 %v166_v31, %v124_v29 }
  0xfc   :  { %v129_v34 = vmul.f32 %v127_v32, %v113_v15  ;;  %v135_v35 = vrot.slane %v127_v32, %v134_v30 }
  0xfe   :  { %v130_v36 = vsub.f32 %v128_v33, %v129_v34  ;;  %v137_v37 = vmul.f32 %v135_v35, %v101_v6 }
 0x100   :  { %v142_v38 = vrot.slane %v130_v36, %v134_v30 }
 0x102   :  { %v144_v39 = vadd.f32 %v142_v38, %v137_v37 }
 0x104   :  { %v145_v40 = vmax.f32 %v144_v39, 0.0 }
 0x106   :  { %146 = vst.msk [vmem:[%s228_s5] sm:$0xff] %vm104_vm2, %v145_v40 }

</bundles_post_ra>
